<compile_context>
chip_gen: v5e
topology: v5e:2x2
jax: 0.10.0
libtpu: 0.0.40
codegen_flags: <defaults>
</compile_context>

<pallas_src>
import math

import jax
import jax.numpy as jnp
from jax.experimental import pallas as pl
from jax.experimental.pallas import tpu as pltpu


ROW_DIM_HEAD = 64  # SAINT hard-codes dim_head=64 for the intersample (row) attention.


def _gelu_tanh(x):
    # TODO(synk): PyTorch F.gelu defaults to the exact erf formulation; the tanh
    # approximation is used for guaranteed Mosaic lowering (max error ~1e-3).
    c = math.sqrt(2.0 / math.pi)
    return 0.5 * x * (1.0 + jnp.tanh(c * (x + 0.044715 * x * x * x)))


# ----------------------------------------------------------------------------
# fused encoder (+ classification head) kernel: grid=(L,) over stacked weights
# ----------------------------------------------------------------------------
def _make_encoder_kernel(B, n, D, H, dh, dhr):
    inner_c = H * dh
    inner_r = H * dhr
    dim_r = n * D
    scale_c = dh ** -0.5
    scale_r = dhr ** -0.5
    eps = 1e-5
    bf16 = jnp.bfloat16
    f32 = jnp.float32

    def ln(x, g, b):                      # LayerNorm over the last dim (f32)
        mu = jnp.mean(x, axis=-1, keepdims=True)
        var = jnp.mean((x - mu) ** 2, axis=-1, keepdims=True)
        return (x - mu) * jax.lax.rsqrt(var + eps) * g + b

    def softmax_last(s):                  # exact softmax (parity with torch)
        s = s - jnp.max(s, axis=-1, keepdims=True)
        p = jnp.exp(s)
        return p / jnp.sum(p, axis=-1, keepdims=True)

    def bmm(x, w):                        # (B,M,K) x (K,N) bf16 weight -> (B,M,N) f32
        wb = jnp.broadcast_to(w, (B,) + w.shape)
        return jnp.einsum('bmk,bkn->bmn', x.astype(bf16), wb,
                          preferred_element_type=f32)

    def kernel(x_ref,
               ln1_ref, wqkv_c_ref, wo_c_ref, bo_c_ref,
               ln2_ref, w1_c_ref, b1_c_ref, w2_c_ref, b2_c_ref,
               ln3_ref, wqkv_r_ref, wo_r_ref, bo_r_ref,
               ln4_ref, w1_r_ref, b1_r_ref, w2_r_ref, b2_r_ref,
               fcw_ref, fcb_ref, bng_ref, bnb_ref, bnm_ref, bnv_ref,
               o_ref, xs_ref, xf_ref):
        l = pl.program_id(0)

        @pl.when(l == 0)
        def _():
            xs_ref[...] = x_ref[...].astype(f32)

        # -------- column (per-sample, over tokens) self-attention --------
        x = xs_ref[...]                                         # (B, n, D) f32
        y = ln(x, ln1_ref[0, 0:1, :], ln1_ref[0, 1:2, :])
        qkv = bmm(y, wqkv_c_ref[0])                             # ONE fused QKV matmul -> (B, n, 3*H*dh)
        attn = None
        for h in range(H):
            q = qkv[:, :, h * dh:(h + 1) * dh]
            k = qkv[:, :, inner_c + h * dh:inner_c + (h + 1) * dh]
            v = qkv[:, :, 2 * inner_c + h * dh:2 * inner_c + (h + 1) * dh]
            s = jnp.einsum('bnd,bmd->bnm', q, k,
                           preferred_element_type=f32) * scale_c
            p = softmax_last(s)
            oh = jnp.einsum('bnm,bmd->bnd', p, v, preferred_element_type=f32)
            c = bmm(oh, wo_c_ref[0, h])                         # (B, n, D)
            attn = c if attn is None else attn + c
        # SAINT composes PreNorm(Residual(f)):  out = f(LN(x)) + LN(x)
        x = attn + bo_c_ref[0] + y

        # -------- column GEGLU feed-forward --------
        y = ln(x, ln2_ref[0, 0:1, :], ln2_ref[0, 1:2, :])
        hcat = bmm(y, w1_c_ref[0]) + b1_c_ref[0]                # ONE fused matmul -> (B, n, 4D)
        act = hcat[:, :, :2 * D] * _gelu_tanh(hcat[:, :, 2 * D:])
        x = bmm(act, w2_c_ref[0]) + b2_c_ref[0] + y             # (B, n, D)

        # -------- row (intersample, over the batch) self-attention --------
        # Stage the token state in its flat 'b n d -> b (n d)' layout (tiny VMEM
        # scratch) so the whole row path runs as a few wide 2-D matmuls.
        for j in range(n):
            xf_ref[:, j * D:(j + 1) * D] = x[:, j, :]
        xf = xf_ref[...]                                        # (B, n*D) f32
        y = ln(xf, ln3_ref[0, 0:1, :], ln3_ref[0, 1:2, :])
        qkv = jnp.dot(y.astype(bf16), wqkv_r_ref[0],
                      preferred_element_type=f32)               # ONE fused QKV matmul -> (B, 3*H*64)
        out = None
        for h in range(H):
            q = qkv[:, h * dhr:(h + 1) * dhr]
            k = qkv[:, inner_r + h * dhr:inner_r + (h + 1) * dhr]
            v = qkv[:, 2 * inner_r + h * dhr:2 * inner_r + (h + 1) * dhr]
            s = jax.lax.dot_general(q, k, (((1,), (1,)), ((), ())),
                                    preferred_element_type=f32) * scale_r
            p = softmax_last(s)                                 # (B, B)
            oh = jnp.dot(p, v, preferred_element_type=f32)      # (B, 64)
            c = jnp.dot(oh.astype(bf16), wo_r_ref[0, h],
                        preferred_element_type=f32)             # (B, n*D)
            out = c if out is None else out + c
        xf = out + bo_r_ref[0] + y

        # -------- row GEGLU feed-forward (flat, lane-aligned split) --------
        y = ln(xf, ln4_ref[0, 0:1, :], ln4_ref[0, 1:2, :])
        hcat = jnp.dot(y.astype(bf16), w1_r_ref[0],
                       preferred_element_type=f32) + b1_r_ref[0]     # (B, 4*n*D)
        act = hcat[:, :2 * dim_r] * _gelu_tanh(hcat[:, 2 * dim_r:])
        xf = jnp.dot(act.astype(bf16), w2_r_ref[0],
                     preferred_element_type=f32) + b2_r_ref[0] + y   # (B, n*D)

        # -------- write back for the next layer / classification head --------
        last = pl.num_programs(0) - 1

        @pl.when(l < last)
        def _():
            for j in range(n):
                xs_ref[:, j, :] = xf[:, j * D:(j + 1) * D]

        @pl.when(l == last)
        def _():
            xc = xf[:, :D]                                       # CLS token (B, D)
            z = jnp.dot(xc, fcw_ref[...], preferred_element_type=f32) + fcb_ref[...]
            # TODO(synk): BatchNorm1d is eval-mode (running stats) only.
            z = (z - bnm_ref[...]) * jax.lax.rsqrt(bnv_ref[...] + 1e-5) * bng_ref[...] + bnb_ref[...]
            o_ref[...] = jnp.maximum(z, 0.0).astype(o_ref.dtype)

    return kernel


# ----------------------------------------------------------------------------
# continuous-feature MLP embedding: one kernel for all features
# ----------------------------------------------------------------------------
def _cont_mlp_kernel(xc_ref, w1_ref, b1_ref, w2_ref, b2_ref, o_ref):
    h = jnp.maximum(xc_ref[...] * w1_ref[...] + b1_ref[...], 0.0)      # (C, B, Hp)
    out = jnp.einsum('cbh,chd->cbd', h, w2_ref[...],
                     preferred_element_type=jnp.float32) + b2_ref[...]
    o_ref[...] = out.astype(o_ref.dtype)


def cont_mlp(x_cont, w1, b1, w2, b2):
    """Per-feature simple_MLP([1, 100, D]) embedding of the continuous columns."""
    B, C = x_cont.shape
    Hh = w1.shape[-1]
    D = w2.shape[-1]
    Hp = ((Hh + 127) // 128) * 128                   # pad hidden 100 -> 128 (exact: zeros)
    w1p = jnp.pad(w1, ((0, 0), (0, 0), (0, Hp - Hh)))
    b1p = jnp.pad(b1, ((0, 0), (0, 0), (0, Hp - Hh)))
    w2p = jnp.pad(w2, ((0, 0), (0, Hp - Hh), (0, 0)))
    xc = x_cont.T.reshape(C, B, 1)
    out = pl.pallas_call(
        _cont_mlp_kernel,
        out_shape=jax.ShapeDtypeStruct((C, B, D), x_cont.dtype),
    )(xc, w1p, b1p, w2p, b2)
    return jnp.transpose(out, (1, 0, 2))             # (B, C, D)


# ----------------------------------------------------------------------------
# weight packing (plain JAX, done once outside the kernel)
# ----------------------------------------------------------------------------
_PACK_ORDER = ("ln1", "wqkv_c", "wo_c", "bo_c",
               "ln2", "w1_c", "b1_c", "w2_c", "b2_c",
               "ln3", "wqkv_r", "wo_r", "bo_r",
               "ln4", "w1_r", "b1_r", "w2_r", "b2_r")


def pack_layer_params(layers, n, D, heads, dh, dhr):
    """Stack per-layer weights on a leading L axis; matmul weights in bf16."""
    H = heads
    dim_r = n * D
    wdt = jnp.bfloat16

    def pack_one(p):
        return dict(
            # column attention: fused QKV weight used as-is, out-proj split per head
            ln1=jnp.stack([p["ln1_g"], p["ln1_b"]], axis=0),               # (2, D) f32
            wqkv_c=p["attn1_wqkv"].astype(wdt),                            # (D, 3*H*dh)
            wo_c=p["attn1_wout"].reshape(H, dh, D).astype(wdt),            # (H, dh, D)
            bo_c=p["attn1_bout"].reshape(1, D),
            # column GEGLU FF
            ln2=jnp.stack([p["ln2_g"], p["ln2_b"]], axis=0),
            w1_c=p["ff1_w1"].astype(wdt),                                  # (D, 4D)
            b1_c=p["ff1_b1"].reshape(1, 4 * D),
            w2_c=p["ff1_w2"].astype(wdt),                                  # (2D, D)
            b2_c=p["ff1_b2"].reshape(1, D),
            # row attention: flat '(n d)' layout -> weights used directly
            ln3=jnp.stack([p["ln3_g"], p["ln3_b"]], axis=0),               # (2, n*D)
            wqkv_r=p["attn2_wqkv"].astype(wdt),                            # (n*D, 3*H*64)
            wo_r=p["attn2_wout"].reshape(H, dhr, dim_r).astype(wdt),       # (H, 64, n*D)
            bo_r=p["attn2_bout"].reshape(1, dim_r),
            # row GEGLU FF
            ln4=jnp.stack([p["ln4_g"], p["ln4_b"]], axis=0),
            w1_r=p["ff2_w1"].astype(wdt),                                  # (n*D, 4*n*D)
            b1_r=p["ff2_b1"].reshape(1, 4 * dim_r),
            w2_r=p["ff2_w2"].astype(wdt),                                  # (2*n*D, n*D)
            b2_r=p["ff2_b2"].reshape(1, dim_r),
        )

    per_layer = [pack_one(p) for p in layers]
    return {k: jnp.stack([q[k] for q in per_layer], axis=0) for k in _PACK_ORDER}


# ----------------------------------------------------------------------------
# fused-encoder wrapper
# ----------------------------------------------------------------------------
def encoder_head_forward(x, packed, head, *, heads, dh, dhr):
    B, n, D = x.shape
    L = packed["ln1"].shape[0]
    O = head["fc_b"].shape[0]

    def lspec(a):                                     # per-layer stacked weight
        nd = a.ndim
        return pl.BlockSpec((1,) + a.shape[1:], lambda l, nd=nd: (l,) + (0,) * (nd - 1))

    def cspec(a):                                     # grid-invariant input
        nd = a.ndim
        return pl.BlockSpec(a.shape, lambda l, nd=nd: (0,) * nd)

    layer_args = [packed[k] for k in _PACK_ORDER]
    head_args = [head["fc_w"], head["fc_b"].reshape(1, O), head["bn_g"].reshape(1, O),
                 head["bn_b"].reshape(1, O), head["bn_rm"].reshape(1, O),
                 head["bn_rv"].reshape(1, O)]

    in_specs = ([cspec(x)]
                + [lspec(a) for a in layer_args]
                + [cspec(a) for a in head_args])

    return pl.pallas_call(
        _make_encoder_kernel(B, n, D, heads, dh, dhr),
        out_shape=jax.ShapeDtypeStruct((B, O), x.dtype),
        grid=(L,),
        in_specs=in_specs,
        out_specs=pl.BlockSpec((B, O), lambda l: (0, 0)),
        scratch_shapes=[pltpu.VMEM((B, n, D), jnp.float32),      # resident token state
                        pltpu.VMEM((B, n * D), jnp.float32)],    # flat-layout staging
        compiler_params=pltpu.CompilerParams(
            dimension_semantics=("arbitrary",),
            # TODO(synk): re-derive this budget for large feature counts on v7x
            # (64 MiB physical VMEM); bf16 weights keep this config well below it.
            vmem_limit_bytes=32 * 1024 * 1024),
    )(x, *layer_args, *head_args)


# ----------------------------------------------------------------------------
# Model glue (embed_data_mask + fused encoder + head)
# ----------------------------------------------------------------------------
def embed_data_mask(x_categ, x_cont, cat_mask, con_mask, params, setup):
    x_categ = x_categ + setup["categories_offset"]
    x_categ_enc = jnp.take(params["embeds"], x_categ, axis=0)            # (B, ncat, D)
    x_cont_enc = cont_mlp(x_cont, params["mlp_w1"], params["mlp_b1"],
                          params["mlp_w2"], params["mlp_b2"])            # (B, ncon, D)
    cat_mask_emb = jnp.take(params["mask_embeds_cat"],
                            cat_mask + setup["cat_mask_offset"], axis=0)
    con_mask_emb = jnp.take(params["mask_embeds_cont"],
                            con_mask + setup["con_mask_offset"], axis=0)
    x_categ_enc = jnp.where((cat_mask == 0)[..., None], cat_mask_emb, x_categ_enc)
    x_cont_enc = jnp.where((con_mask == 0)[..., None], con_mask_emb, x_cont_enc)
    return x_categ, x_categ_enc, x_cont_enc


def tab_encoder_forward(params, setup, config, x_categ, x_cont, cat_mask, con_mask):
    _, x_categ_enc, x_cont_enc = embed_data_mask(
        x_categ, x_cont, cat_mask, con_mask, params, setup)
    x = jnp.concatenate([x_categ_enc, x_cont_enc], axis=1)               # (B, nfeats, D)
    B, n, D = x.shape
    packed = pack_layer_params(params["layers"], n=n, D=D,
                               heads=config["n_heads"], dh=config["head_dim"],
                               dhr=ROW_DIM_HEAD)
    head = dict(fc_w=params["fc_w"], fc_b=params["fc_b"], bn_g=params["bn_g"],
                bn_b=params["bn_b"], bn_rm=params["bn_rm"], bn_rv=params["bn_rv"])
    return encoder_head_forward(x, packed, head, heads=config["n_heads"],
                                dh=config["head_dim"], dhr=ROW_DIM_HEAD)


# ----------------------------------------------------------------------------
# Deterministic parameter init (shapes follow TabEncoder.__init__)
# ----------------------------------------------------------------------------
def init_params(key, config, categories, num_continuous, output_dim):
    D = config["dim"]
    H = config["n_heads"]
    dh = config["head_dim"]
    L = config["n_layers"]
    ncat = len(categories)
    total_tokens = sum(categories)
    nfeats = ncat + num_continuous
    dim_r = nfeats * D
    inner_c = H * dh
    inner_r = H * ROW_DIM_HEAD

    keys = iter(jax.random.split(key, 128))

    def nrm(shape, scale=0.02):
        return (scale * jax.random.normal(next(keys), shape)).astype(jnp.float32)

    params = {
        "embeds": nrm((total_tokens, D)),
        "mask_embeds_cat": nrm((ncat * 2, D)),
        "mask_embeds_cont": nrm((num_continuous * 2, D)),
        "mlp_w1": nrm((num_continuous, 1, 100)),
        "mlp_b1": nrm((num_continuous, 1, 100)),
        "mlp_w2": nrm((num_continuous, 100, D)),
        "mlp_b2": nrm((num_continuous, 1, D)),
        "fc_w": nrm((D, output_dim)),
        "fc_b": jnp.zeros((output_dim,), jnp.float32),
        "bn_g": jnp.ones((output_dim,), jnp.float32),
        "bn_b": jnp.zeros((output_dim,), jnp.float32),
        "bn_rm": jnp.zeros((output_dim,), jnp.float32),
        "bn_rv": jnp.ones((output_dim,), jnp.float32),
        "layers": [],
    }
    for _ in range(L):
        params["layers"].append({
            "ln1_g": jnp.ones((D,), jnp.float32), "ln1_b": jnp.zeros((D,), jnp.float32),
            "attn1_wqkv": nrm((D, 3 * inner_c)),
            "attn1_wout": nrm((inner_c, D)),
            "attn1_bout": jnp.zeros((D,), jnp.float32),
            "ln2_g": jnp.ones((D,), jnp.float32), "ln2_b": jnp.zeros((D,), jnp.float32),
            "ff1_w1": nrm((D, 4 * D)), "ff1_b1": jnp.zeros((4 * D,), jnp.float32),
            "ff1_w2": nrm((2 * D, D)), "ff1_b2": jnp.zeros((D,), jnp.float32),
            "ln3_g": jnp.ones((dim_r,), jnp.float32), "ln3_b": jnp.zeros((dim_r,), jnp.float32),
            "attn2_wqkv": nrm((dim_r, 3 * inner_r)),
            "attn2_wout": nrm((inner_r, dim_r)),
            "attn2_bout": jnp.zeros((dim_r,), jnp.float32),
            "ln4_g": jnp.ones((dim_r,), jnp.float32), "ln4_b": jnp.zeros((dim_r,), jnp.float32),
            "ff2_w1": nrm((dim_r, 4 * dim_r)), "ff2_b1": jnp.zeros((4 * dim_r,), jnp.float32),
            "ff2_w2": nrm((2 * dim_r, dim_r)), "ff2_b2": jnp.zeros((dim_r,), jnp.float32),
        })

    setup = {
        "categories_offset": jnp.cumsum(
            jnp.array((0,) + tuple(categories), jnp.int32))[:-1],
        "cat_mask_offset": (2 * jnp.arange(ncat, dtype=jnp.int32)),
        "con_mask_offset": (2 * jnp.arange(num_continuous, dtype=jnp.int32)),
    }
    return params, setup


# ----------------------------------------------------------------------------
if __name__ == "__main__":
    config = dict(dim=32, n_layers=2, n_heads=4, head_dim=8, dropout=0.0)
    categories = (3, 5, 7)
    num_continuous = 3
    output_dim = 16
    B = 4

    key = jax.random.PRNGKey(0)
    kp, kc, kx, km1, km2 = jax.random.split(key, 5)
    params, setup = init_params(kp, config, categories, num_continuous, output_dim)

    cat_keys = jax.random.split(kc, len(categories))
    x_categ = jnp.stack(
        [jax.random.randint(cat_keys[i], (B,), 0, categories[i], dtype=jnp.int32)
         for i in range(len(categories))], axis=1)                      # (B, 3)
    x_cont = jax.random.normal(kx, (B, num_continuous), jnp.float32)    # (B, 3)
    cat_mask = jax.random.randint(km1, (B, len(categories)), 0, 2, dtype=jnp.int32)
    con_mask = jax.random.randint(km2, (B, num_continuous), 0, 2, dtype=jnp.int32)

    out = tab_encoder_forward(params, setup, config,
                              x_categ, x_cont, cat_mask, con_mask)
    jax.block_until_ready(out)
    assert out.shape == (B, output_dim), out.shape
    print("KERNEL_OK")
</pallas_src>

<mosaic_0001>
module attributes {stable_mosaic.version = 11 : i64} {
  func.func @_cont_mlp_kernel(%arg0: memref<3x4x1xf32, #tpu.memory_space<vmem>>, %arg1: memref<3x1x128xf32, #tpu.memory_space<vmem>>, %arg2: memref<3x1x128xf32, #tpu.memory_space<vmem>>, %arg3: memref<3x128x32xf32, #tpu.memory_space<vmem>>, %arg4: memref<3x1x32xf32, #tpu.memory_space<vmem>>, %arg5: memref<3x4x32xf32, #tpu.memory_space<vmem>>) attributes {dimension_semantics = [], scalar_prefetch = 0 : i64, scratch_operands = 0 : i64, tpu.core_type = #tpu.core_type<tc>} {
    %c0 = arith.constant 0 : index
    %c0_0 = arith.constant 0 : index
    %c0_1 = arith.constant 0 : index
    %0 = vector.load %arg0[%c0, %c0_0, %c0_1] : memref<3x4x1xf32, #tpu.memory_space<vmem>>, vector<3x4x1xf32>
    %c0_2 = arith.constant 0 : index
    %c0_3 = arith.constant 0 : index
    %c0_4 = arith.constant 0 : index
    %1 = vector.load %arg1[%c0_2, %c0_3, %c0_4] : memref<3x1x128xf32, #tpu.memory_space<vmem>>, vector<3x1x128xf32>
    %2 = vector.broadcast %0 : vector<3x4x1xf32> to vector<3x4x128xf32>
    %3 = vector.broadcast %1 : vector<3x1x128xf32> to vector<3x4x128xf32>
    %4 = arith.mulf %2, %3 : vector<3x4x128xf32>
    %c0_5 = arith.constant 0 : index
    %c0_6 = arith.constant 0 : index
    %c0_7 = arith.constant 0 : index
    %5 = vector.load %arg2[%c0_5, %c0_6, %c0_7] : memref<3x1x128xf32, #tpu.memory_space<vmem>>, vector<3x1x128xf32>
    %6 = vector.broadcast %5 : vector<3x1x128xf32> to vector<3x4x128xf32>
    %7 = arith.addf %4, %6 : vector<3x4x128xf32>
    %cst = arith.constant 0.000000e+00 : f32
    %8 = vector.broadcast %cst : f32 to vector<3x4x128xf32>
    %9 = arith.maximumf %7, %8 : vector<3x4x128xf32>
    %c0_8 = arith.constant 0 : index
    %c0_9 = arith.constant 0 : index
    %c0_10 = arith.constant 0 : index
    %10 = vector.load %arg3[%c0_8, %c0_9, %c0_10] : memref<3x128x32xf32, #tpu.memory_space<vmem>>, vector<3x128x32xf32>
    "tpu.trace_start"() <{level = 10 : i32, message = "cbh,chd->cbd"}> : () -> ()
    %cst_11 = arith.constant dense<0.000000e+00> : vector<3x4x32xf32>
    %11 = tpu.matmul %9, %10, %cst_11 {dimension_numbers = #tpu.dot_dimension_numbers<[2], [1], [1], [2], [0, 0, 0, 1, 1, 2], [0], [0]>} : vector<3x4x128xf32>, vector<3x128x32xf32>, vector<3x4x32xf32> -> vector<3x4x32xf32>
    "tpu.trace_stop"() : () -> ()
    %c0_12 = arith.constant 0 : index
    %c0_13 = arith.constant 0 : index
    %c0_14 = arith.constant 0 : index
    %12 = vector.load %arg4[%c0_12, %c0_13, %c0_14] : memref<3x1x32xf32, #tpu.memory_space<vmem>>, vector<3x1x32xf32>
    %13 = vector.broadcast %12 : vector<3x1x32xf32> to vector<3x4x32xf32>
    %14 = arith.addf %11, %13 : vector<3x4x32xf32>
    %c0_15 = arith.constant 0 : index
    %c0_16 = arith.constant 0 : index
    %c0_17 = arith.constant 0 : index
    %15 = vector.load %arg5[%c0_15, %c0_16, %c0_17] : memref<3x4x32xf32, #tpu.memory_space<vmem>>, vector<3x4x32xf32>
    tpu.vector_store %arg5[%c0_15, %c0_16, %c0_17], %14 {strides = array<i32>} : memref<3x4x32xf32, #tpu.memory_space<vmem>>, vector<3x4x32xf32>,
    return
  }
}

</mosaic_0001>

<bundles_post_ra>
// kernel: tpu_custom_call.1
= control target key start
LH: loop header
LB: loop body
LE: loop exit
PB: predicated region body
PF: predicated region fallthrough
CT: control target
= control target key end

     0   :  { %v255_v3 = vmov 0   ;;  %s472_s0 = inlined_call_operand.vmem [shape: f32[3,4,1], index: 0, kind: input, shape index: {}]   ;;  %s473_s1 = inlined_call_operand.vmem [shape: f32[3,1,128], index: 1, kind: input, shape index: {}]   ;;  %s474_s2 = inlined_call_operand.vmem [shape: f32[3,1,128], index: 2, kind: input, shape index: {}]   ;;  %s475_s3 = inlined_call_operand.vmem [shape: f32[3,128,32], index: 3, kind: input, shape index: {}]   ;;  %s476_s4 = inlined_call_operand.vmem [shape: f32[3,1,32], index: 4, kind: input, shape index: {}]   ;;  %s477_s5 = inlined_call_operand.hbm [shape: f32[3,4,32], index: 5, kind: output, shape index: {}]  }
   0x1   :  { %v23_v0 = vld [vmem:[%s472_s0 + $0x8] sm:$0xf]  ;;  %v22_v1 = vld [vmem:[%s472_s0 + $0x4] sm:$0xf]  ;;  %v119_v2 = vld [vmem:[%s475_s3 + $0x178] sm:$0xff]  ;;  %218 = vset.pattern.permute.xlu0 %v255_v3  ;;  %219 = vset.pattern.permute.xlu1 %v255_v3 }
   0x2   :  { %39 = vperm.xlu0 %218, %v23_v0   ;;  %34 = vperm.xlu1 %219, %v22_v1   ;;  %v118_v4 = vld [vmem:[%s475_s3 + $0x170] sm:$0xff]  ;;  %v87_v5 = vld [vmem:[%s475_s3 + $0x78] sm:$0xff]  ;;  %v117_v9 = vld [vmem:[%s475_s3 + $0x168] sm:$0xff] }
   0x3   :  { %v103_v6 = vld [vmem:[%s475_s3 + $0xf8] sm:$0xff]  ;;  %172 = vmatpush.msra.mxu2 %v119_v2  ;;  %132 = vmatpush.msra.mxu0 %v87_v5  ;;  %v86_v7 = vld [vmem:[%s475_s3 + $0x70] sm:$0xff]  ;;  %v85_v10 = vld [vmem:[%s475_s3 + $0x68] sm:$0xff] }
   0x4   :  { %v102_v8 = vld [vmem:[%s475_s3 + $0xf0] sm:$0xff]  ;;  %152 = vmatpush.msra.mxu1 %v103_v6  ;;  %v101_v11 = vld [vmem:[%s475_s3 + $0xe8] sm:$0xff]  ;;  %v116_v12 = vld [vmem:[%s475_s3 + $0x160] sm:$0xff] }
   0x5   :  { %173 = vmatpush.msra.mxu2 %v118_v4  ;;  %133 = vmatpush.msra.mxu0 %v86_v7  ;;  %v84_v13 = vld [vmem:[%s475_s3 + $0x60] sm:$0xff]  ;;  %v115_v16 = vld [vmem:[%s475_s3 + $0x158] sm:$0xff]  ;;  %v114_v18 = vld [vmem:[%s475_s3 + $0x150] sm:$0xff] }
   0x6   :  { %153 = vmatpush.msra.mxu1 %v102_v8  ;;  %v21_v14 = vld [vmem:[%s472_s0] sm:$0xf]  ;;  %v83_v17 = vld [vmem:[%s475_s3 + $0x58] sm:$0xff]  ;;  %v113_v20 = vld [vmem:[%s475_s3 + $0x148] sm:$0xff] }
   0x7   :  { %174 = vmatpush.msra.mxu2 %v117_v9  ;;  %134 = vmatpush.msra.mxu0 %v85_v10  ;;  %v100_v15 = vld [vmem:[%s475_s3 + $0xe0] sm:$0xff]  ;;  %v99_v19 = vld [vmem:[%s475_s3 + $0xd8] sm:$0xff]  ;;  %v82_v21 = vld [vmem:[%s475_s3 + $0x50] sm:$0xff] }
   0x8   :  { %154 = vmatpush.msra.mxu1 %v101_v11  ;;  %v98_v22 = vld [vmem:[%s475_s3 + $0xd0] sm:$0xff]  ;;  %v81_v23 = vld [vmem:[%s475_s3 + $0x48] sm:$0xff]  ;;  %v112_v25 = vld [vmem:[%s475_s3 + $0x140] sm:$0xff] }
   0x9   :  { %175 = vmatpush.msra.mxu2 %v116_v12  ;;  %135 = vmatpush.msra.mxu0 %v84_v13  ;;  %v97_v24 = vld [vmem:[%s475_s3 + $0xc8] sm:$0xff]  ;;  %v80_v26 = vld [vmem:[%s475_s3 + $0x40] sm:$0xff] }
   0xa   :  { %29 = vperm.xlu0 %218, %v21_v14   ;;  %155 = vmatpush.msra.mxu1 %v100_v15 }
   0xb   :  { %176 = vmatpush.msra.mxu2 %v115_v16  ;;  %136 = vmatpush.msra.mxu0 %v83_v17 }
   0xc   :  { %156 = vmatpush.msra.mxu1 %v99_v19 }
   0xd   :  { %177 = vmatpush.msra.mxu2 %v114_v18  ;;  %137 = vmatpush.msra.mxu0 %v82_v21 }
   0xe   :  { %157 = vmatpush.msra.mxu1 %v98_v22 }
   0xf   :  { %10 = vsyncpa [#allocation3], 0  ;;  %178 = vmatpush.msra.mxu2 %v113_v20  ;;  %138 = vmatpush.msra.mxu0 %v81_v23  ;;  %v96_v27 = vld [vmem:[%s475_s3 + $0xc0] sm:$0xff]  ;;  %v111_v28 = vld [vmem:[%s475_s3 + $0x138] sm:$0xff]  ;;  %vm192_vm0 = vcmask 257024   ;;  %s256_s6 = smov [#allocation2]  }
  0x10   :  { %158 = vmatpush.msra.mxu1 %v97_v24  ;;  %v79_v29 = vld [vmem:[%s475_s3 + $0x38] sm:$0xff]  ;;  %v110_v31 = vld [vmem:[%s475_s3 + $0x130] sm:$0xff]  ;;  %v109_v32 = vld [vmem:[%s475_s3 + $0x128] sm:$0xff]  ;;  %s200_s7 = sshll.u32 %s256_s6, 4  ;;  %s202_s10 = sshll.u32 %s477_s5, 4  ;;  %s201_s7 = int_to_ptr.vmem [resolvable:$true] %s200_s7  ;;  %s203_s10 = int_to_ptr.hbm [resolvable:$true] %s202_s10 }
  0x11   :  { %179 = vmatpush.msra.mxu2 %v112_v25  ;;  %139 = vmatpush.msra.mxu0 %v80_v26  ;;  %v95_v30 = vld [vmem:[%s475_s3 + $0xb8] sm:$0xff]  ;;  %v108_v33 = vld [vmem:[%s475_s3 + $0x120] sm:$0xff]  ;;  %v78_v35 = vld [vmem:[%s475_s3 + $0x30] sm:$0xff]  ;;  %s257_s11 = smov 64   ;;  %s258_s12 = smov 4  }
  0x12   :  { %159 = vmatpush.msra.mxu1 %v96_v27  ;;  %v107_v34 = vld [vmem:[%s475_s3 + $0x118] sm:$0xff]  ;;  %v94_v36 = vld [vmem:[%s475_s3 + $0xb0] sm:$0xff]  ;;  %v77_v38 = vld [vmem:[%s475_s3 + $0x28] sm:$0xff] }
  0x13   :  { %180 = vmatpush.msra.mxu2 %v111_v28  ;;  %140 = vmatpush.msra.mxu0 %v79_v29  ;;  %v106_v37 = vld [vmem:[%s475_s3 + $0x110] sm:$0xff]  ;;  %v93_v39 = vld [vmem:[%s475_s3 + $0xa8] sm:$0xff]  ;;  %v76_v41 = vld [vmem:[%s475_s3 + $0x20] sm:$0xff] }
  0x14   :  { %160 = vmatpush.msra.mxu1 %v95_v30  ;;  %v105_v40 = vld [vmem:[%s475_s3 + $0x108] sm:$0xff]  ;;  %v92_v42 = vld [vmem:[%s475_s3 + $0xa0] sm:$0xff]  ;;  %v75_v44 = vld [vmem:[%s475_s3 + $0x18] sm:$0xff] }
  0x15   :  { %181 = vmatpush.msra.mxu2 %v110_v31  ;;  %141 = vmatpush.msra.mxu0 %v78_v35  ;;  %v104_v43 = vld [vmem:[%s475_s3 + $0x100] sm:$0xff]  ;;  %v91_v45 = vld [vmem:[%s475_s3 + $0x98] sm:$0xff]  ;;  %v74_v46 = vld [vmem:[%s475_s3 + $0x10] sm:$0xff] }
  0x16   :  { %161 = vmatpush.msra.mxu1 %v94_v36  ;;  %v90_v47 = vld [vmem:[%s475_s3 + $0x90] sm:$0xff]  ;;  %v73_v48 = vld [vmem:[%s475_s3 + $0x8] sm:$0xff]  ;;  %v72_v50 = vld [vmem:[%s475_s3] sm:$0xff] }
  0x17   :  { %182 = vmatpush.msra.mxu2 %v109_v32  ;;  %142 = vmatpush.msra.mxu0 %v77_v38  ;;  %v89_v49 = vld [vmem:[%s475_s3 + $0x88] sm:$0xff]  ;;  %v88_v51 = vld [vmem:[%s475_s3 + $0x80] sm:$0xff] }
  0x18   :  { %162 = vmatpush.msra.mxu1 %v93_v39  ;;  %v220_v52 = vld [vmem:[%s473_s1 + $0x2] ss:$0 sm:$0xff]  ;;  %v222_v53 = vld [vmem:[%s473_s1 + $0x1] ss:$0 sm:$0xff]  ;;  %v223_v63 = vld [vmem:[%s473_s1] ss:$0 sm:$0xff] }
  0x19   :  { %183 = vmatpush.msra.mxu2 %v108_v33  ;;  %143 = vmatpush.msra.mxu0 %v76_v41  ;;  %v221_v54 = vld [vmem:[%s474_s2 + $0x2] ss:$0 sm:$0xff]  ;;  %v225_v55 = vld [vmem:[%s474_s2 + $0x1] ss:$0 sm:$0xff]  ;;  %v224_v1 = vld [vmem:[%s474_s2] ss:$0 sm:$0xff] }
  0x1a   :  { %163 = vmatpush.msra.mxu1 %v92_v42  ;;  %v228_v6 = vld [vmem:[%s476_s4 + $0x1] ss:$0 sm:$0xff]  ;;  %v226_v9 = vld [vmem:[%s476_s4 + $0x2] ss:$0 sm:$0xff]  ;;  %v227_v10 = vld [vmem:[%s476_s4] ss:$0 sm:$0xff] }
  0x1b   :  { %184 = vmatpush.msra.mxu2 %v107_v34  ;;  %144 = vmatpush.msra.mxu0 %v75_v44 }
  0x1c   :  { %164 = vmatpush.msra.mxu1 %v91_v45 }
  0x1d   :  { %185 = vmatpush.msra.mxu2 %v106_v37  ;;  %145 = vmatpush.msra.mxu0 %v74_v46 }
  0x1e   :  { %165 = vmatpush.msra.mxu1 %v90_v47 }
  0x1f   :  { %186 = vmatpush.msra.mxu2 %v105_v40  ;;  %146 = vmatpush.msra.mxu0 %v73_v48 }
  0x20   :  { %166 = vmatpush.msra.mxu1 %v89_v49 }
  0x21   :  { %187 = vmatpush.msra.mxu2 %v104_v43  ;;  %147 = vmatpush.msra.mxu0 %v72_v50 }
  0x22   :  { %167 = vmatpush.msra.mxu1 %v88_v51 }
  0x74   :  { %v40_v56 = vpop.permute.xlu0 %39  ;;  %v35_v57 = vpop.permute.xlu1 %34 }
  0x75   :  { %v53_v58 = vmul.f32 %v220_v52, %v40_v56  ;;  %v52_v59 = vmul.f32 %v222_v53, %v35_v57 }
  0x77   :  { %v68_v60 = vadd.f32 %v221_v54, %v53_v58  ;;  %v67_v61 = vadd.f32 %v225_v55, %v52_v59 }
  0x79   :  { %v71_v62 = vmax.f32 %v68_v60, 0.0  ;;  %v70_v0 = vmax.f32 %v67_v61, 0.0 }
  0x7b   :  { %188 = vmatmul.f32.vlgmr.msra.gmra.mxu2 %v71_v62  ;;  %168 = vmatmul.f32.vlgmr.msra.gmra.mxu1 %v70_v0 }
  0x7c   :  { %v30_v2 = vpop.permute.xlu0 %29 }
  0x7d   :  { %v51_v3 = vmul.f32 %v223_v63, %v30_v2 }
  0x7f   :  { %v66_v4 = vadd.f32 %v224_v1, %v51_v3 }
  0x81   :  { %v69_v5 = vmax.f32 %v66_v4, 0.0 }
  0x83   :  { %148 = vmatmul.f32.vlgmr.msra.gmra.mxu0 %v69_v5 }
  0xf8   :  { %v169_v7 = vpop.f32.mrf.mxu1 }
  0xf9   :  { %v170_v8 = vadd.f32 %v228_v6, %v169_v7 }
  0xfb   :  { %194 = vst.msk [vmem:[#allocation2 + $0x4] sm:$0xf] %vm192_vm0, %v170_v8 }
  0xfe   :  { %v189_v11 = vpop.f32.mrf.mxu2 }
  0xff   :  { %v190_v12 = vadd.f32 %v226_v9, %v189_v11 }
 0x100   :  { %v149_v13 = vpop.f32.mrf.mxu0 }
 0x101   :  { %195 = vst.msk [vmem:[#allocation2 + $0x8] sm:$0xf] %vm192_vm0, %v190_v12  ;;  %v150_v14 = vadd.f32 %v227_v10, %v149_v13 }
 0x103   :  { %193 = vst.msk [vmem:[#allocation2] sm:$0xf] %vm192_vm0, %v150_v14 }
 0x104   :  { %208 = dma.vmem_to_hbm [thread:$0]  %s201_s7, 192, %s203_s10, [#allocation3], %s257_s11, %s257_s11, %s258_s12  }
 0x105   :  { %253 = dma.done.wait [#allocation3], 192  }
 0x106   :  { %254 = vsyncadd [#allocation3], 4294967104 }
 0x107   :  { %213 = vsyncpa [#allocation3], 1 }

</bundles_post_ra>
